<compile_context>
chip_gen: v6e
topology: v6e:2x2x1
jax: 0.10.0
libtpu: 0.0.40
codegen_flags: <defaults>
</compile_context>

<pallas_src>
import functools

import jax
import jax.numpy as jnp
from jax import lax
from jax.experimental import pallas as pl
from jax.experimental.pallas import tpu as pltpu


# Network dims and static offsets of each layer's weights/bias inside the packed
# parameter vector (weights stored row-major as (fan_in, fan_out), i.e. already
# transposed relative to PyTorch's (out, in)).
DIMS = (1, 4, 5, 3, 1)
_LAYER_OFFSETS = []
_off = 0
for _fi, _fo in zip(DIMS[:-1], DIMS[1:]):
    _w_off = _off
    _off += _fi * _fo
    _b_off = _off
    _off += _fo
    _LAYER_OFFSETS.append((_w_off, _b_off))
PARAM_COUNT = _off          # 55 scalars total
PACKED_LEN = 64             # pad to a power of two for SMEM friendliness

LANES = 128                 # batch maps to the lane axis
STRIP_ROWS = 8              # rows per in-kernel strip: 1 vreg per channel plane
NEG_SLOPE = 0.2


def _ceil_div(a, b):
    return -(-a // b)


def _round_up(a, b):
    return _ceil_div(a, b) * b


def mlp_kernel(p_ref, x_ref, o_ref, *, block_rows, compute_dtype):
    """p_ref: (PACKED_LEN,) f32 in SMEM. x_ref/o_ref: (block_rows, 128) f32 in VMEM.

    Each element of the (rows, 128) tile is one sample (the model has a single
    input feature). The whole 1-4-5-3-1 net is evaluated per (STRIP_ROWS, 128)
    strip so the ~13 live channel planes stay in vregs; every hidden channel is a
    scalar-broadcast FMA plane on the VPU (no MXU), and leaky_relu is the 2-op
    maximum form.
    """
    n_layers = len(DIMS) - 1
    last = n_layers - 1

    # Hoist all 55 parameter scalars out of the strip loop (cheap SMEM reads,
    # loop-invariant for the compiler).
    w_f32 = [p_ref[i] for i in range(PARAM_COUNT)]
    if compute_dtype == jnp.float32:
        w_cd = w_f32
    else:
        w_cd = [v.astype(compute_dtype) for v in w_f32]

    def compute_strip(r0, h):
        planes = [x_ref[pl.ds(r0, h), :].astype(compute_dtype)]
        # Hidden layers in compute_dtype.
        for layer in range(last):
            fan_in, fan_out = DIMS[layer], DIMS[layer + 1]
            w_off, b_off = _LAYER_OFFSETS[layer]
            new_planes = []
            for k in range(fan_out):
                acc = planes[0] * w_cd[w_off + k]
                for j in range(1, fan_in):
                    acc = acc + planes[j] * w_cd[w_off + j * fan_out + k]
                acc = acc + w_cd[b_off + k]
                # leaky_relu(x) == max(x, 0.2*x) exactly, since 0 < slope < 1.
                acc = jnp.maximum(acc, acc * NEG_SLOPE)
                new_planes.append(acc)
            planes = new_planes
        # Output layer (3 -> 1), accumulated in f32 regardless of compute dtype.
        fan_in, fan_out = DIMS[last], DIMS[last + 1]          # fan_out == 1
        w_off, b_off = _LAYER_OFFSETS[last]
        out = planes[0].astype(jnp.float32) * w_f32[w_off]
        for j in range(1, fan_in):
            out = out + planes[j].astype(jnp.float32) * w_f32[w_off + j * fan_out]
        out = out + w_f32[b_off]
        o_ref[pl.ds(r0, h), :] = out.astype(o_ref.dtype)

    n_full = block_rows // STRIP_ROWS
    rem = block_rows % STRIP_ROWS

    if n_full > 0:
        def body(s, carry):
            r0 = pl.multiple_of(s * STRIP_ROWS, STRIP_ROWS)
            compute_strip(r0, STRIP_ROWS)
            return carry
        lax.fori_loop(0, n_full, body, 0)
    if rem:  # only for tiny batches where the block equals the full (sub-8-row) array
        compute_strip(n_full * STRIP_ROWS, rem)


def pack_params(params):
    """Flatten [(W_t, b), ...] (W_t shaped (in, out), b shaped (1, out)) into one
    f32 vector of length PACKED_LEN, matching the static offsets above."""
    parts = []
    for w, b in params:
        parts.append(jnp.asarray(w, jnp.float32).reshape(-1))
        parts.append(jnp.asarray(b, jnp.float32).reshape(-1))
    flat = jnp.concatenate(parts)
    assert flat.shape[0] == PARAM_COUNT
    return jnp.pad(flat, (0, PACKED_LEN - PARAM_COUNT))


def mlp_forward(x, params, *, tile_rows=2048, compute_dtype=jnp.float32):
    """x: (B, 1) or (B,) float32. Returns (B, 1) float32.

    tile_rows: sublane rows per grid step (rounded to a multiple of 8). The default
    2048 gives 1 MiB per in/out buffer (~4 MiB double-buffered VMEM), far under every
    generation's scoped-VMEM default, and keeps the ~0.35 us per-grid-step overhead
    below ~5% of a step's VPU work.
    compute_dtype: jnp.float32 (default, bit-level headroom vs the f32 reference) or
    jnp.bfloat16 (faster packed-bf16 VALU on v6e/v7x; final layer still f32).
    """
    x = jnp.asarray(x, jnp.float32)
    assert x.ndim == 1 or (x.ndim == 2 and x.shape[1] == 1), x.shape
    B = x.shape[0]
    packed = pack_params(params)

    rows = _ceil_div(B, LANES)
    padded_elems = rows * LANES

    xf = x.reshape(-1)
    if padded_elems != B:
        # Pad only to the next whole 128-lane row (<= 127 zeros). The ragged row
        # remainder at the tile boundary is handled by Pallas's partial last block,
        # so no tile-multiple padding / full-array copy is needed.
        xf = jnp.pad(xf, (0, padded_elems - B))
    xp = xf.reshape(rows, LANES)          # free bitcast when no padding was added

    # Choose the block (tile) height.
    tile_rows = max(STRIP_ROWS, (tile_rows // STRIP_ROWS) * STRIP_ROWS)
    if rows <= STRIP_ROWS:
        block_rows = rows                 # block equals the full (tiny) array dims
    elif rows <= tile_rows:
        # Aim for >= 2 grid steps so both v7x TensorCores get work.
        block_rows = max(STRIP_ROWS, _round_up(_ceil_div(rows, 2), STRIP_ROWS))
    else:
        block_rows = tile_rows
    grid = (_ceil_div(rows, block_rows),)

    # Only raise the scoped-VMEM limit if an oversized tile actually needs it
    # (v5e's default scoped limit is ~16 MiB; default tiles stay well under it).
    block_bytes = block_rows * LANES * 4
    vmem_need = 4 * block_bytes + (2 << 20)   # double-buffered in+out + headroom
    vmem_limit = vmem_need if vmem_need > (12 << 20) else None

    kernel = functools.partial(
        mlp_kernel, block_rows=block_rows, compute_dtype=compute_dtype)

    out = pl.pallas_call(
        kernel,
        out_shape=jax.ShapeDtypeStruct((rows, LANES), jnp.float32),
        grid=grid,
        in_specs=[
            # All 55 params as one small SMEM-resident block (no per-array DMAs).
            pl.BlockSpec(memory_space=pltpu.MemorySpace.SMEM),
            # Lane-dense batch tile, pipelined (double-buffered) over the grid.
            pl.BlockSpec((block_rows, LANES), lambda i: (i, 0)),
        ],
        out_specs=pl.BlockSpec((block_rows, LANES), lambda i: (i, 0)),
        compiler_params=pltpu.CompilerParams(
            dimension_semantics=("parallel",),   # shard batch tiles across TCs (v7x)
            vmem_limit_bytes=vmem_limit,
        ),
    )(packed, xp)

    if padded_elems == B:
        return out.reshape(B, 1)                 # pure bitcast, no copy
    return out.reshape(-1)[:B].reshape(B, 1)     # slice only when padding was added


def init_params(key):
    """Deterministic init matching the module: xavier_normal_ weights, bias=0.1.
    PyTorch weight shape is (out, in); we store the transpose (in, out).
    Note: uses JAX's PRNG, so values are distributionally (not bit-) identical to
    torch.nn.init.xavier_normal_; pass packed torch weights for exact comparison."""
    params = []
    keys = jax.random.split(key, len(DIMS) - 1)
    for k, fan_in, fan_out in zip(keys, DIMS[:-1], DIMS[1:]):
        std = (2.0 / (fan_in + fan_out)) ** 0.5
        w = std * jax.random.normal(k, (fan_out, fan_in), dtype=jnp.float32)
        w_t = w.T                                   # (in, out)
        b = jnp.full((1, fan_out), 0.1, dtype=jnp.float32)
        params.append((w_t, b))
    return params


def mlp_reference(x, params):
    h = jnp.asarray(x, jnp.float32).reshape(-1, 1)
    for i, (w, b) in enumerate(params):
        h = h @ w + b
        if i < len(params) - 1:
            h = jnp.where(h > 0, h, NEG_SLOPE * h)
    return h


if __name__ == "__main__":
    key = jax.random.PRNGKey(0)
    k_param, k_x_small, k_x_mid, k_x_big = jax.random.split(key, 4)

    params = init_params(k_param)

    # Small batch matching the module's typical use (single partial block).
    x_small = jax.random.normal(k_x_small, (8, 1), dtype=jnp.float32)
    out_small = jax.block_until_ready(mlp_forward(x_small, params))
    ref_small = mlp_reference(x_small, params)
    assert out_small.shape == (8, 1)
    assert jnp.allclose(out_small, ref_small, atol=1e-5, rtol=1e-5)

    # Exact 128-lane multiple: no input pad, no output slice, 2-step grid (v7x path).
    x_mid = jax.random.normal(k_x_mid, (4096, 1), dtype=jnp.float32)
    out_mid = jax.block_until_ready(mlp_forward(x_mid, params))
    ref_mid = mlp_reference(x_mid, params)
    assert out_mid.shape == (4096, 1)
    assert jnp.allclose(out_mid, ref_mid, atol=1e-5, rtol=1e-5)

    # Ragged batch: 128-lane pad + partial last block + multi-step grid.
    x_big = jax.random.normal(k_x_big, (5000, 1), dtype=jnp.float32)
    out_big = jax.block_until_ready(mlp_forward(x_big, params))
    ref_big = mlp_reference(x_big, params)
    assert out_big.shape == (5000, 1)
    assert jnp.allclose(out_big, ref_big, atol=1e-5, rtol=1e-5)

    # bf16 compute path (the v6e/v7x fast path); looser tolerance vs the f32 reference.
    out_bf16 = jax.block_until_ready(
        mlp_forward(x_small, params, compute_dtype=jnp.bfloat16))
    assert out_bf16.shape == (8, 1)
    assert jnp.allclose(out_bf16, ref_small, atol=1e-1, rtol=1e-1)

    print("KERNEL_OK")
</pallas_src>

<mosaic_0001>
module attributes {stable_mosaic.version = 11 : i64} {
  func.func @mlp_kernel(%arg0: i32, %arg1: memref<64xf32, #tpu.memory_space<smem>>, %arg2: memref<1x128xf32, #tpu.memory_space<vmem>>, %arg3: memref<1x128xf32, #tpu.memory_space<vmem>>) attributes {dimension_semantics = [#tpu.dimension_semantics<parallel>], iteration_bounds = array<i64: 1>, scalar_prefetch = 0 : i64, scratch_operands = 0 : i64, tpu.core_type = #tpu.core_type<tc>, window_params = [{transform_indices = @transform_0, window_bounds = array<i64: 64>}, {transform_indices = @transform_1, window_bounds = array<i64: 1, 128>}, {transform_indices = @transform_2, window_bounds = array<i64: 1, 128>}]} {
    %c0 = arith.constant 0 : index
    %0 = memref.load %arg1[%c0] : memref<64xf32, #tpu.memory_space<smem>>
    %c1 = arith.constant 1 : index
    %1 = memref.load %arg1[%c1] : memref<64xf32, #tpu.memory_space<smem>>
    %c2 = arith.constant 2 : index
    %2 = memref.load %arg1[%c2] : memref<64xf32, #tpu.memory_space<smem>>
    %c3 = arith.constant 3 : index
    %3 = memref.load %arg1[%c3] : memref<64xf32, #tpu.memory_space<smem>>
    %c4 = arith.constant 4 : index
    %4 = memref.load %arg1[%c4] : memref<64xf32, #tpu.memory_space<smem>>
    %c5 = arith.constant 5 : index
    %5 = memref.load %arg1[%c5] : memref<64xf32, #tpu.memory_space<smem>>
    %c6 = arith.constant 6 : index
    %6 = memref.load %arg1[%c6] : memref<64xf32, #tpu.memory_space<smem>>
    %c7 = arith.constant 7 : index
    %7 = memref.load %arg1[%c7] : memref<64xf32, #tpu.memory_space<smem>>
    %c8 = arith.constant 8 : index
    %8 = memref.load %arg1[%c8] : memref<64xf32, #tpu.memory_space<smem>>
    %c9 = arith.constant 9 : index
    %9 = memref.load %arg1[%c9] : memref<64xf32, #tpu.memory_space<smem>>
    %c10 = arith.constant 10 : index
    %10 = memref.load %arg1[%c10] : memref<64xf32, #tpu.memory_space<smem>>
    %c11 = arith.constant 11 : index
    %11 = memref.load %arg1[%c11] : memref<64xf32, #tpu.memory_space<smem>>
    %c12 = arith.constant 12 : index
    %12 = memref.load %arg1[%c12] : memref<64xf32, #tpu.memory_space<smem>>
    %c13 = arith.constant 13 : index
    %13 = memref.load %arg1[%c13] : memref<64xf32, #tpu.memory_space<smem>>
    %c14 = arith.constant 14 : index
    %14 = memref.load %arg1[%c14] : memref<64xf32, #tpu.memory_space<smem>>
    %c15 = arith.constant 15 : index
    %15 = memref.load %arg1[%c15] : memref<64xf32, #tpu.memory_space<smem>>
    %c16 = arith.constant 16 : index
    %16 = memref.load %arg1[%c16] : memref<64xf32, #tpu.memory_space<smem>>
    %c17 = arith.constant 17 : index
    %17 = memref.load %arg1[%c17] : memref<64xf32, #tpu.memory_space<smem>>
    %c18 = arith.constant 18 : index
    %18 = memref.load %arg1[%c18] : memref<64xf32, #tpu.memory_space<smem>>
    %c19 = arith.constant 19 : index
    %19 = memref.load %arg1[%c19] : memref<64xf32, #tpu.memory_space<smem>>
    %c20 = arith.constant 20 : index
    %20 = memref.load %arg1[%c20] : memref<64xf32, #tpu.memory_space<smem>>
    %c21 = arith.constant 21 : index
    %21 = memref.load %arg1[%c21] : memref<64xf32, #tpu.memory_space<smem>>
    %c22 = arith.constant 22 : index
    %22 = memref.load %arg1[%c22] : memref<64xf32, #tpu.memory_space<smem>>
    %c23 = arith.constant 23 : index
    %23 = memref.load %arg1[%c23] : memref<64xf32, #tpu.memory_space<smem>>
    %c24 = arith.constant 24 : index
    %24 = memref.load %arg1[%c24] : memref<64xf32, #tpu.memory_space<smem>>
    %c25 = arith.constant 25 : index
    %25 = memref.load %arg1[%c25] : memref<64xf32, #tpu.memory_space<smem>>
    %c26 = arith.constant 26 : index
    %26 = memref.load %arg1[%c26] : memref<64xf32, #tpu.memory_space<smem>>
    %c27 = arith.constant 27 : index
    %27 = memref.load %arg1[%c27] : memref<64xf32, #tpu.memory_space<smem>>
    %c28 = arith.constant 28 : index
    %28 = memref.load %arg1[%c28] : memref<64xf32, #tpu.memory_space<smem>>
    %c29 = arith.constant 29 : index
    %29 = memref.load %arg1[%c29] : memref<64xf32, #tpu.memory_space<smem>>
    %c30 = arith.constant 30 : index
    %30 = memref.load %arg1[%c30] : memref<64xf32, #tpu.memory_space<smem>>
    %c31 = arith.constant 31 : index
    %31 = memref.load %arg1[%c31] : memref<64xf32, #tpu.memory_space<smem>>
    %c32 = arith.constant 32 : index
    %32 = memref.load %arg1[%c32] : memref<64xf32, #tpu.memory_space<smem>>
    %c33 = arith.constant 33 : index
    %33 = memref.load %arg1[%c33] : memref<64xf32, #tpu.memory_space<smem>>
    %c34 = arith.constant 34 : index
    %34 = memref.load %arg1[%c34] : memref<64xf32, #tpu.memory_space<smem>>
    %c35 = arith.constant 35 : index
    %35 = memref.load %arg1[%c35] : memref<64xf32, #tpu.memory_space<smem>>
    %c36 = arith.constant 36 : index
    %36 = memref.load %arg1[%c36] : memref<64xf32, #tpu.memory_space<smem>>
    %c37 = arith.constant 37 : index
    %37 = memref.load %arg1[%c37] : memref<64xf32, #tpu.memory_space<smem>>
    %c38 = arith.constant 38 : index
    %38 = memref.load %arg1[%c38] : memref<64xf32, #tpu.memory_space<smem>>
    %c39 = arith.constant 39 : index
    %39 = memref.load %arg1[%c39] : memref<64xf32, #tpu.memory_space<smem>>
    %c40 = arith.constant 40 : index
    %40 = memref.load %arg1[%c40] : memref<64xf32, #tpu.memory_space<smem>>
    %c41 = arith.constant 41 : index
    %41 = memref.load %arg1[%c41] : memref<64xf32, #tpu.memory_space<smem>>
    %c42 = arith.constant 42 : index
    %42 = memref.load %arg1[%c42] : memref<64xf32, #tpu.memory_space<smem>>
    %c43 = arith.constant 43 : index
    %43 = memref.load %arg1[%c43] : memref<64xf32, #tpu.memory_space<smem>>
    %c44 = arith.constant 44 : index
    %44 = memref.load %arg1[%c44] : memref<64xf32, #tpu.memory_space<smem>>
    %c45 = arith.constant 45 : index
    %45 = memref.load %arg1[%c45] : memref<64xf32, #tpu.memory_space<smem>>
    %c46 = arith.constant 46 : index
    %46 = memref.load %arg1[%c46] : memref<64xf32, #tpu.memory_space<smem>>
    %c47 = arith.constant 47 : index
    %47 = memref.load %arg1[%c47] : memref<64xf32, #tpu.memory_space<smem>>
    %c48 = arith.constant 48 : index
    %48 = memref.load %arg1[%c48] : memref<64xf32, #tpu.memory_space<smem>>
    %c49 = arith.constant 49 : index
    %49 = memref.load %arg1[%c49] : memref<64xf32, #tpu.memory_space<smem>>
    %c50 = arith.constant 50 : index
    %50 = memref.load %arg1[%c50] : memref<64xf32, #tpu.memory_space<smem>>
    %c51 = arith.constant 51 : index
    %51 = memref.load %arg1[%c51] : memref<64xf32, #tpu.memory_space<smem>>
    %c52 = arith.constant 52 : index
    %52 = memref.load %arg1[%c52] : memref<64xf32, #tpu.memory_space<smem>>
    %c53 = arith.constant 53 : index
    %53 = memref.load %arg1[%c53] : memref<64xf32, #tpu.memory_space<smem>>
    %c54 = arith.constant 54 : index
    %54 = memref.load %arg1[%c54] : memref<64xf32, #tpu.memory_space<smem>>
    %c0_0 = arith.constant 0 : index
    %c0_1 = arith.constant 0 : index
    %55 = vector.load %arg2[%c0_0, %c0_1] : memref<1x128xf32, #tpu.memory_space<vmem>>, vector<1x128xf32>
    %56 = vector.broadcast %0 : f32 to vector<1x128xf32>
    %57 = arith.mulf %55, %56 : vector<1x128xf32>
    %58 = vector.broadcast %4 : f32 to vector<1x128xf32>
    %59 = arith.addf %57, %58 : vector<1x128xf32>
    %cst = arith.constant 2.000000e-01 : f32
    %60 = vector.broadcast %cst : f32 to vector<1x128xf32>
    %61 = arith.mulf %59, %60 : vector<1x128xf32>
    %62 = arith.maximumf %59, %61 : vector<1x128xf32>
    %63 = vector.broadcast %1 : f32 to vector<1x128xf32>
    %64 = arith.mulf %55, %63 : vector<1x128xf32>
    %65 = vector.broadcast %5 : f32 to vector<1x128xf32>
    %66 = arith.addf %64, %65 : vector<1x128xf32>
    %cst_2 = arith.constant 2.000000e-01 : f32
    %67 = vector.broadcast %cst_2 : f32 to vector<1x128xf32>
    %68 = arith.mulf %66, %67 : vector<1x128xf32>
    %69 = arith.maximumf %66, %68 : vector<1x128xf32>
    %70 = vector.broadcast %2 : f32 to vector<1x128xf32>
    %71 = arith.mulf %55, %70 : vector<1x128xf32>
    %72 = vector.broadcast %6 : f32 to vector<1x128xf32>
    %73 = arith.addf %71, %72 : vector<1x128xf32>
    %cst_3 = arith.constant 2.000000e-01 : f32
    %74 = vector.broadcast %cst_3 : f32 to vector<1x128xf32>
    %75 = arith.mulf %73, %74 : vector<1x128xf32>
    %76 = arith.maximumf %73, %75 : vector<1x128xf32>
    %77 = vector.broadcast %3 : f32 to vector<1x128xf32>
    %78 = arith.mulf %55, %77 : vector<1x128xf32>
    %79 = vector.broadcast %7 : f32 to vector<1x128xf32>
    %80 = arith.addf %78, %79 : vector<1x128xf32>
    %cst_4 = arith.constant 2.000000e-01 : f32
    %81 = vector.broadcast %cst_4 : f32 to vector<1x128xf32>
    %82 = arith.mulf %80, %81 : vector<1x128xf32>
    %83 = arith.maximumf %80, %82 : vector<1x128xf32>
    %84 = vector.broadcast %8 : f32 to vector<1x128xf32>
    %85 = arith.mulf %62, %84 : vector<1x128xf32>
    %86 = vector.broadcast %13 : f32 to vector<1x128xf32>
    %87 = arith.mulf %69, %86 : vector<1x128xf32>
    %88 = arith.addf %85, %87 : vector<1x128xf32>
    %89 = vector.broadcast %18 : f32 to vector<1x128xf32>
    %90 = arith.mulf %76, %89 : vector<1x128xf32>
    %91 = arith.addf %88, %90 : vector<1x128xf32>
    %92 = vector.broadcast %23 : f32 to vector<1x128xf32>
    %93 = arith.mulf %83, %92 : vector<1x128xf32>
    %94 = arith.addf %91, %93 : vector<1x128xf32>
    %95 = vector.broadcast %28 : f32 to vector<1x128xf32>
    %96 = arith.addf %94, %95 : vector<1x128xf32>
    %cst_5 = arith.constant 2.000000e-01 : f32
    %97 = vector.broadcast %cst_5 : f32 to vector<1x128xf32>
    %98 = arith.mulf %96, %97 : vector<1x128xf32>
    %99 = arith.maximumf %96, %98 : vector<1x128xf32>
    %100 = vector.broadcast %9 : f32 to vector<1x128xf32>
    %101 = arith.mulf %62, %100 : vector<1x128xf32>
    %102 = vector.broadcast %14 : f32 to vector<1x128xf32>
    %103 = arith.mulf %69, %102 : vector<1x128xf32>
    %104 = arith.addf %101, %103 : vector<1x128xf32>
    %105 = vector.broadcast %19 : f32 to vector<1x128xf32>
    %106 = arith.mulf %76, %105 : vector<1x128xf32>
    %107 = arith.addf %104, %106 : vector<1x128xf32>
    %108 = vector.broadcast %24 : f32 to vector<1x128xf32>
    %109 = arith.mulf %83, %108 : vector<1x128xf32>
    %110 = arith.addf %107, %109 : vector<1x128xf32>
    %111 = vector.broadcast %29 : f32 to vector<1x128xf32>
    %112 = arith.addf %110, %111 : vector<1x128xf32>
    %cst_6 = arith.constant 2.000000e-01 : f32
    %113 = vector.broadcast %cst_6 : f32 to vector<1x128xf32>
    %114 = arith.mulf %112, %113 : vector<1x128xf32>
    %115 = arith.maximumf %112, %114 : vector<1x128xf32>
    %116 = vector.broadcast %10 : f32 to vector<1x128xf32>
    %117 = arith.mulf %62, %116 : vector<1x128xf32>
    %118 = vector.broadcast %15 : f32 to vector<1x128xf32>
    %119 = arith.mulf %69, %118 : vector<1x128xf32>
    %120 = arith.addf %117, %119 : vector<1x128xf32>
    %121 = vector.broadcast %20 : f32 to vector<1x128xf32>
    %122 = arith.mulf %76, %121 : vector<1x128xf32>
    %123 = arith.addf %120, %122 : vector<1x128xf32>
    %124 = vector.broadcast %25 : f32 to vector<1x128xf32>
    %125 = arith.mulf %83, %124 : vector<1x128xf32>
    %126 = arith.addf %123, %125 : vector<1x128xf32>
    %127 = vector.broadcast %30 : f32 to vector<1x128xf32>
    %128 = arith.addf %126, %127 : vector<1x128xf32>
    %cst_7 = arith.constant 2.000000e-01 : f32
    %129 = vector.broadcast %cst_7 : f32 to vector<1x128xf32>
    %130 = arith.mulf %128, %129 : vector<1x128xf32>
    %131 = arith.maximumf %128, %130 : vector<1x128xf32>
    %132 = vector.broadcast %11 : f32 to vector<1x128xf32>
    %133 = arith.mulf %62, %132 : vector<1x128xf32>
    %134 = vector.broadcast %16 : f32 to vector<1x128xf32>
    %135 = arith.mulf %69, %134 : vector<1x128xf32>
    %136 = arith.addf %133, %135 : vector<1x128xf32>
    %137 = vector.broadcast %21 : f32 to vector<1x128xf32>
    %138 = arith.mulf %76, %137 : vector<1x128xf32>
    %139 = arith.addf %136, %138 : vector<1x128xf32>
    %140 = vector.broadcast %26 : f32 to vector<1x128xf32>
    %141 = arith.mulf %83, %140 : vector<1x128xf32>
    %142 = arith.addf %139, %141 : vector<1x128xf32>
    %143 = vector.broadcast %31 : f32 to vector<1x128xf32>
    %144 = arith.addf %142, %143 : vector<1x128xf32>
    %cst_8 = arith.constant 2.000000e-01 : f32
    %145 = vector.broadcast %cst_8 : f32 to vector<1x128xf32>
    %146 = arith.mulf %144, %145 : vector<1x128xf32>
    %147 = arith.maximumf %144, %146 : vector<1x128xf32>
    %148 = vector.broadcast %12 : f32 to vector<1x128xf32>
    %149 = arith.mulf %62, %148 : vector<1x128xf32>
    %150 = vector.broadcast %17 : f32 to vector<1x128xf32>
    %151 = arith.mulf %69, %150 : vector<1x128xf32>
    %152 = arith.addf %149, %151 : vector<1x128xf32>
    %153 = vector.broadcast %22 : f32 to vector<1x128xf32>
    %154 = arith.mulf %76, %153 : vector<1x128xf32>
    %155 = arith.addf %152, %154 : vector<1x128xf32>
    %156 = vector.broadcast %27 : f32 to vector<1x128xf32>
    %157 = arith.mulf %83, %156 : vector<1x128xf32>
    %158 = arith.addf %155, %157 : vector<1x128xf32>
    %159 = vector.broadcast %32 : f32 to vector<1x128xf32>
    %160 = arith.addf %158, %159 : vector<1x128xf32>
    %cst_9 = arith.constant 2.000000e-01 : f32
    %161 = vector.broadcast %cst_9 : f32 to vector<1x128xf32>
    %162 = arith.mulf %160, %161 : vector<1x128xf32>
    %163 = arith.maximumf %160, %162 : vector<1x128xf32>
    %164 = vector.broadcast %33 : f32 to vector<1x128xf32>
    %165 = arith.mulf %99, %164 : vector<1x128xf32>
    %166 = vector.broadcast %36 : f32 to vector<1x128xf32>
    %167 = arith.mulf %115, %166 : vector<1x128xf32>
    %168 = arith.addf %165, %167 : vector<1x128xf32>
    %169 = vector.broadcast %39 : f32 to vector<1x128xf32>
    %170 = arith.mulf %131, %169 : vector<1x128xf32>
    %171 = arith.addf %168, %170 : vector<1x128xf32>
    %172 = vector.broadcast %42 : f32 to vector<1x128xf32>
    %173 = arith.mulf %147, %172 : vector<1x128xf32>
    %174 = arith.addf %171, %173 : vector<1x128xf32>
    %175 = vector.broadcast %45 : f32 to vector<1x128xf32>
    %176 = arith.mulf %163, %175 : vector<1x128xf32>
    %177 = arith.addf %174, %176 : vector<1x128xf32>
    %178 = vector.broadcast %48 : f32 to vector<1x128xf32>
    %179 = arith.addf %177, %178 : vector<1x128xf32>
    %cst_10 = arith.constant 2.000000e-01 : f32
    %180 = vector.broadcast %cst_10 : f32 to vector<1x128xf32>
    %181 = arith.mulf %179, %180 : vector<1x128xf32>
    %182 = arith.maximumf %179, %181 : vector<1x128xf32>
    %183 = vector.broadcast %34 : f32 to vector<1x128xf32>
    %184 = arith.mulf %99, %183 : vector<1x128xf32>
    %185 = vector.broadcast %37 : f32 to vector<1x128xf32>
    %186 = arith.mulf %115, %185 : vector<1x128xf32>
    %187 = arith.addf %184, %186 : vector<1x128xf32>
    %188 = vector.broadcast %40 : f32 to vector<1x128xf32>
    %189 = arith.mulf %131, %188 : vector<1x128xf32>
    %190 = arith.addf %187, %189 : vector<1x128xf32>
    %191 = vector.broadcast %43 : f32 to vector<1x128xf32>
    %192 = arith.mulf %147, %191 : vector<1x128xf32>
    %193 = arith.addf %190, %192 : vector<1x128xf32>
    %194 = vector.broadcast %46 : f32 to vector<1x128xf32>
    %195 = arith.mulf %163, %194 : vector<1x128xf32>
    %196 = arith.addf %193, %195 : vector<1x128xf32>
    %197 = vector.broadcast %49 : f32 to vector<1x128xf32>
    %198 = arith.addf %196, %197 : vector<1x128xf32>
    %cst_11 = arith.constant 2.000000e-01 : f32
    %199 = vector.broadcast %cst_11 : f32 to vector<1x128xf32>
    %200 = arith.mulf %198, %199 : vector<1x128xf32>
    %201 = arith.maximumf %198, %200 : vector<1x128xf32>
    %202 = vector.broadcast %35 : f32 to vector<1x128xf32>
    %203 = arith.mulf %99, %202 : vector<1x128xf32>
    %204 = vector.broadcast %38 : f32 to vector<1x128xf32>
    %205 = arith.mulf %115, %204 : vector<1x128xf32>
    %206 = arith.addf %203, %205 : vector<1x128xf32>
    %207 = vector.broadcast %41 : f32 to vector<1x128xf32>
    %208 = arith.mulf %131, %207 : vector<1x128xf32>
    %209 = arith.addf %206, %208 : vector<1x128xf32>
    %210 = vector.broadcast %44 : f32 to vector<1x128xf32>
    %211 = arith.mulf %147, %210 : vector<1x128xf32>
    %212 = arith.addf %209, %211 : vector<1x128xf32>
    %213 = vector.broadcast %47 : f32 to vector<1x128xf32>
    %214 = arith.mulf %163, %213 : vector<1x128xf32>
    %215 = arith.addf %212, %214 : vector<1x128xf32>
    %216 = vector.broadcast %50 : f32 to vector<1x128xf32>
    %217 = arith.addf %215, %216 : vector<1x128xf32>
    %cst_12 = arith.constant 2.000000e-01 : f32
    %218 = vector.broadcast %cst_12 : f32 to vector<1x128xf32>
    %219 = arith.mulf %217, %218 : vector<1x128xf32>
    %220 = arith.maximumf %217, %219 : vector<1x128xf32>
    %221 = vector.broadcast %51 : f32 to vector<1x128xf32>
    %222 = arith.mulf %182, %221 : vector<1x128xf32>
    %223 = vector.broadcast %52 : f32 to vector<1x128xf32>
    %224 = arith.mulf %201, %223 : vector<1x128xf32>
    %225 = arith.addf %222, %224 : vector<1x128xf32>
    %226 = vector.broadcast %53 : f32 to vector<1x128xf32>
    %227 = arith.mulf %220, %226 : vector<1x128xf32>
    %228 = arith.addf %225, %227 : vector<1x128xf32>
    %229 = vector.broadcast %54 : f32 to vector<1x128xf32>
    %230 = arith.addf %228, %229 : vector<1x128xf32>
    %c0_13 = arith.constant 0 : index
    %c0_14 = arith.constant 0 : index
    %231 = vector.load %arg3[%c0_13, %c0_14] : memref<1x128xf32, #tpu.memory_space<vmem>>, vector<1x128xf32>
    tpu.vector_store %arg3[%c0_13, %c0_14], %230 {strides = array<i32>} : memref<1x128xf32, #tpu.memory_space<vmem>>, vector<1x128xf32>,
    return
  }
  func.func @transform_0(%arg0: i32) -> i32 {
    %c0_i32 = arith.constant 0 : i32
    %c0_i32_0 = arith.constant 0 : i32
    return %c0_i32 : i32
  }
  func.func @transform_1(%arg0: i32) -> (i32, i32) {
    %c0_i32 = arith.constant 0 : i32
    %c0_i32_0 = arith.constant 0 : i32
    return %arg0, %c0_i32 : i32, i32
  }
  func.func @transform_2(%arg0: i32) -> (i32, i32) {
    %c0_i32 = arith.constant 0 : i32
    %c0_i32_0 = arith.constant 0 : i32
    return %arg0, %c0_i32 : i32, i32
  }
}

</mosaic_0001>

<bundles_post_ra>
// kernel: tpu_custom_call.1
= control target key start
LH: loop header
LB: loop body
LE: loop exit
PB: predicated region body
PF: predicated region fallthrough
CT: control target
= control target key end

     0   :  { %7 = vsyncpa [#allocation4], 0  ;;  %s471_s0 = inlined_call_operand.hbm [shape: f32[64], index: 0, kind: input, shape index: {}]   ;;  %s472_s1 = inlined_call_operand.vmem [shape: f32[1,128], index: 1, kind: input, shape index: {}]   ;;  %s473_s2 = inlined_call_operand.hbm [shape: f32[1,128], index: 2, kind: output, shape index: {}]  }
   0x1   :  { %8 = vsyncpa [#allocation3], 0  ;;  %s346_s9 = smov [#allocation2]  }
   0x2   :  { %16 = dma.hbm_to_smem %s471_s0, 16, %s346_s9, [#allocation4]  }
   0x3   :  { %342 = dma.done.wait [#allocation4], 16  }
   0x4   :  { %343 = vsyncadd [#allocation4], 4294967280 }
   0x5   :  { %22 = sfence }
   0x6   :  { %s23_s12 = sld [smem:[#allocation2]]  ;;  %v78_v0 = vld [vmem:[%s472_s1] sm:$0x1] }
   0x7   :  { %s258_s13 = sld [smem:[#allocation2 + $0x1]] }
   0x8   :  { %s259_s14 = sld [smem:[#allocation2 + $0x2]] }
   0x9   :  { %s260_s15 = sld [smem:[#allocation2 + $0x3]] }
   0xa   :  { %s261_s16 = sld [smem:[#allocation2 + $0x4]] }
   0xb   :  { %s262_s19 = sld [smem:[#allocation2 + $0x5]] }
   0xc   :  { %s263_s20 = sld [smem:[#allocation2 + $0x6]]  ;;  %v79_v1 = vstv %s23_s12 }
   0xd   :  { %s369_s21 = sld [smem:[#allocation2 + $0x7]]  ;;  %v80_v2 = vmul.f32 %v79_v1, %v78_v0  ;;  %v85_v3 = vstv %s258_s13 }
   0xe   :  { %s371_s0 = sld [smem:[#allocation2 + $0x8]]  ;;  %v86_v4 = vmul.f32 %v85_v3, %v78_v0  ;;  %v91_v5 = vstv %s259_s14 }
   0xf   :  { %s373_s22 = sld [smem:[#allocation2 + $0x9]]  ;;  %v92_v6 = vmul.f32 %v91_v5, %v78_v0  ;;  %v97_v10 = vstv %s260_s15 }
  0x10   :  { %s375_s23 = sld [smem:[#allocation2 + $0xa]]  ;;  %v81_v7 = vstv %s261_s16  ;;  %v98_v16 = vmul.f32 %v97_v10, %v78_v0 }
  0x11   :  { %s377_s24 = sld [smem:[#allocation2 + $0xb]]  ;;  %v82_v8 = vadd.f32 %v81_v7, %v80_v2  ;;  %v87_v9 = vstv %s262_s19 }
  0x12   :  { %s379_s1 = sld [smem:[#allocation2 + $0xc]]  ;;  %v88_v11 = vadd.f32 %v87_v9, %v86_v4  ;;  %v93_v12 = vstv %s263_s20 }
  0x13   :  { %s270_s25 = sld [smem:[#allocation2 + $0xd]]  ;;  %v83_v13 = vmul.f32 0.2, %v82_v8  ;;  %v94_v14 = vadd.f32 %v93_v12, %v92_v6  ;;  %v99_v18 = vstv %s369_s21 }
  0x14   :  { %s271_s26 = sld [smem:[#allocation2 + $0xe]]  ;;  %v89_v15 = vmul.f32 0.2, %v88_v11  ;;  %v103_v21 = vstv %s371_s0  ;;  %v100_v22 = vadd.f32 %v99_v18, %v98_v16 }
  0x15   :  { %s272_s27 = sld [smem:[#allocation2 + $0xf]]  ;;  %v95_v17 = vmul.f32 0.2, %v94_v14  ;;  %v84_v19 = vmax.f32 %v82_v8, %v83_v13  ;;  %v118_v23 = vstv %s373_s22 }
  0x16   :  { %s273_s28 = sld [smem:[#allocation2 + $0x10]]  ;;  %v90_v20 = vmax.f32 %v88_v11, %v89_v15  ;;  %v133_v26 = vstv %s375_s23  ;;  %v101_v35 = vmul.f32 0.2, %v100_v22 }
  0x17   :  { %s382_s29 = sld [smem:[#allocation2 + $0x11]]  ;;  %v96_v24 = vmax.f32 %v94_v14, %v95_v17  ;;  %v104_v27 = vmul.f32 %v103_v21, %v84_v19  ;;  %v148_v30 = vstv %s377_s24  ;;  %v119_v31 = vmul.f32 %v118_v23, %v84_v19 }
  0x18   :  { %s385_s30 = sld [smem:[#allocation2 + $0x12]]  ;;  %v163_v34 = vstv %s379_s1  ;;  %v134_v36 = vmul.f32 %v133_v26, %v84_v19  ;;  %v149_v39 = vmul.f32 %v148_v30, %v84_v19  ;;  %v102_v49 = vmax.f32 %v100_v22, %v101_v35 }
  0x19   :  { %s388_s3 = sld [smem:[#allocation2 + $0x13]]  ;;  %v105_v25 = vstv %s270_s25  ;;  %v164_v44 = vmul.f32 %v163_v34, %v84_v19 }
  0x1a   :  { %s391_s4 = sld [smem:[#allocation2 + $0x14]]  ;;  %v106_v28 = vmul.f32 %v105_v25, %v90_v20  ;;  %v120_v29 = vstv %s271_s26 }
  0x1b   :  { %s394_s5 = sld [smem:[#allocation2 + $0x15]]  ;;  %v121_v32 = vmul.f32 %v120_v29, %v90_v20  ;;  %v135_v33 = vstv %s272_s27 }
  0x1c   :  { %s397_s6 = sld [smem:[#allocation2 + $0x16]]  ;;  %v136_v37 = vmul.f32 %v135_v33, %v90_v20  ;;  %v150_v38 = vstv %s273_s28  ;;  %v107_v42 = vadd.f32 %v106_v28, %v104_v27 }
  0x1d   :  { %s399_s7 = sld [smem:[#allocation2 + $0x17]]  ;;  %v151_v40 = vmul.f32 %v150_v38, %v90_v20  ;;  %v165_v41 = vstv %s382_s29  ;;  %v122_v47 = vadd.f32 %v121_v32, %v119_v31 }
  0x1e   :  { %s402_s8 = sld [smem:[#allocation2 + $0x18]]  ;;  %v108_v43 = vstv %s385_s30  ;;  %v166_v45 = vmul.f32 %v165_v41, %v90_v20  ;;  %v137_v51 = vadd.f32 %v136_v37, %v134_v36 }
  0x1f   :  { %s405_s9 = sld [smem:[#allocation2 + $0x19]]  ;;  %v109_v46 = vmul.f32 %v108_v43, %v96_v24  ;;  %v123_v48 = vstv %s388_s3  ;;  %v152_v54 = vadd.f32 %v151_v40, %v149_v39 }
  0x20   :  { %s408_s10 = sld [smem:[#allocation2 + $0x1a]]  ;;  %v124_v50 = vmul.f32 %v123_v48, %v96_v24  ;;  %v138_v52 = vstv %s391_s4  ;;  %v167_v58 = vadd.f32 %v166_v45, %v164_v44 }
  0x21   :  { %s411_s11 = sld [smem:[#allocation2 + $0x1b]]  ;;  %v139_v53 = vmul.f32 %v138_v52, %v96_v24  ;;  %v153_v55 = vstv %s394_s5  ;;  %v110_v56 = vadd.f32 %v109_v46, %v107_v42 }
  0x22   :  { %s414_s12 = sld [smem:[#allocation2 + $0x1c]]  ;;  %v154_v57 = vmul.f32 %v153_v55, %v96_v24  ;;  %v168_v59 = vstv %s397_s6  ;;  %v125_v61 = vadd.f32 %v124_v50, %v122_v47 }
  0x23   :  { %s286_s13 = sld [smem:[#allocation2 + $0x1d]]  ;;  %v111_v60 = vstv %s399_s7  ;;  %v169_v62 = vmul.f32 %v168_v59, %v96_v24  ;;  %v140_v1 = vadd.f32 %v139_v53, %v137_v51 }
  0x24   :  { %s418_s14 = sld [smem:[#allocation2 + $0x1e]]  ;;  %v112_v63 = vmul.f32 %v111_v60, %v102_v49  ;;  %v126_v0 = vstv %s402_s8  ;;  %v155_v4 = vadd.f32 %v154_v57, %v152_v54 }
  0x25   :  { %s421_s15 = sld [smem:[#allocation2 + $0x1f]]  ;;  %v127_v2 = vmul.f32 %v126_v0, %v102_v49  ;;  %v141_v3 = vstv %s405_s9  ;;  %v170_v8 = vadd.f32 %v169_v62, %v167_v58  ;;  %s347_s9 = smov [#allocation5]  }
  0x26   :  { %s424_s16 = sld [smem:[#allocation2 + $0x20]]  ;;  %v113_v5 = vadd.f32 %v112_v63, %v110_v56  ;;  %v142_v6 = vmul.f32 %v141_v3, %v102_v49  ;;  %v156_v7 = vstv %s408_s10  ;;  %s249_s10 = sshll.u32 %s347_s9, 4  ;;  %s250_s10 = int_to_ptr.vmem [resolvable:$true] %s249_s10 }
  0x27   :  { %s427_s17 = sld [smem:[#allocation2 + $0x21]]  ;;  %v128_v9 = vadd.f32 %v127_v2, %v125_v61  ;;  %v157_v10 = vmul.f32 %v156_v7, %v102_v49  ;;  %v171_v11 = vstv %s411_s11  ;;  %s322_s11 = scalar_lea.vmem %s250_s10, 16 }
  0x28   :  { %s430_s18 = sld [smem:[#allocation2 + $0x22]]  ;;  %v114_v12 = vstv %s414_s12  ;;  %v143_v13 = vadd.f32 %v142_v6, %v140_v1  ;;  %v172_v14 = vmul.f32 %v171_v11, %v102_v49  ;;  %p323_p0 = scmp.ne.s32.totalorder %s250_s10, %s322_s11 }
  0x29   :  { %s433_s19 = sld [smem:[#allocation2 + $0x23]]  ;;  %v115_v15 = vadd.f32 %v114_v12, %v113_v5  ;;  %v129_v16 = vstv %s286_s13  ;;  %v158_v17 = vadd.f32 %v157_v10, %v155_v4  ;;  %s326_s12 = scalar_lea.vmem %s250_s10, 32 }
  0x2a   :  { %s293_s20 = sld [smem:[#allocation2 + $0x24]]  ;;  %v130_v18 = vadd.f32 %v129_v16, %v128_v9  ;;  %v144_v19 = vstv %s418_s14  ;;  %v173_v20 = vadd.f32 %v172_v14, %v170_v8  ;;  %p327_p1 = scmp.lt.s32.totalorder %s250_s10, %s250_s10 }
  0x2b   :  { %s294_s21 = sld [smem:[#allocation2 + $0x25]]  ;;  %v116_v21 = vmul.f32 0.2, %v115_v15  ;;  %v145_v22 = vadd.f32 %v144_v19, %v143_v13  ;;  %v159_v23 = vstv %s421_s15  ;;  %p328_p2 = scmp.lt.s32.totalorder %s326_s12, %s322_s11 }
  0x2c   :  { %s437_s0 = sld [smem:[#allocation2 + $0x26]]  ;;  %v131_v24 = vmul.f32 0.2, %v130_v18  ;;  %v160_v25 = vadd.f32 %v159_v23, %v158_v17  ;;  %v174_v26 = vstv %s424_s16 }
  0x2d   :  { %s296_s22 = sld [smem:[#allocation2 + $0x27]]  ;;  %v117_v27 = vmax.f32 %v115_v15, %v116_v21  ;;  %v146_v28 = vmul.f32 0.2, %v145_v22  ;;  %v178_v29 = vstv %s427_s17  ;;  %v175_v31 = vadd.f32 %v174_v26, %v173_v20  ;;  %p329_p3 = por %p328_p2, %p327_p1 }
  0x2e   :  { %s297_s23 = sld [smem:[#allocation2 + $0x28]]  ;;  %v132_v30 = vmax.f32 %v130_v18, %v131_v24  ;;  %v196_v32 = vstv %s430_s18  ;;  %v161_v33 = vmul.f32 0.2, %v160_v25 }
  0x2f   :  { %s442_s24 = sld [smem:[#allocation2 + $0x29]]  ;;  %v179_v34 = vmul.f32 %v178_v29, %v117_v27  ;;  %v147_v35 = vmax.f32 %v145_v22, %v146_v28  ;;  %v197_v37 = vmul.f32 %v196_v32, %v117_v27  ;;  %v214_v38 = vstv %s433_s19  ;;  %p330_p4 = pnand %p329_p3, %p323_p0 }
  0x30   :  { %s444_s1 = sld [smem:[#allocation2 + $0x2a]]  ;;  %v180_v36 = vstv %s293_s20  ;;  %v215_v41 = vmul.f32 %v214_v38, %v117_v27  ;;  %v176_v42 = vmul.f32 0.2, %v175_v31  ;;  %v162_v45 = vmax.f32 %v160_v25, %v161_v33 }
  0x31   :  { %s447_s25 = sld [smem:[#allocation2 + $0x2b]]  ;;  %v181_v39 = vmul.f32 %v180_v36, %v132_v30  ;;  %v198_v40 = vstv %s294_s21 }
  0x32   :  { %s449_s26 = sld [smem:[#allocation2 + $0x2c]]  ;;  %v199_v43 = vmul.f32 %v198_v40, %v132_v30  ;;  %v216_v44 = vstv %s437_s0  ;;  %v177_v55 = vmax.f32 %v175_v31, %v176_v42 }
  0x33   :  { %s452_s27 = sld [smem:[#allocation2 + $0x2d]]  ;;  %v182_v46 = vadd.f32 %v181_v39, %v179_v34  ;;  %v183_v47 = vstv %s296_s22  ;;  %v217_v48 = vmul.f32 %v216_v44, %v132_v30 }
  0x34   :  { %s303_s28 = sld [smem:[#allocation2 + $0x2e]]  ;;  %v184_v49 = vmul.f32 %v183_v47, %v147_v35  ;;  %v200_v50 = vadd.f32 %v199_v43, %v197_v37  ;;  %v201_v51 = vstv %s297_s23 }
  0x35   :  { %s454_s29 = sld [smem:[#allocation2 + $0x2f]]  ;;  %v202_v52 = vmul.f32 %v201_v51, %v147_v35  ;;  %v218_v53 = vadd.f32 %v217_v48, %v215_v41  ;;  %v219_v54 = vstv %s442_s24 }
  0x36   :  { %s457_s30 = sld [smem:[#allocation2 + $0x30]]  ;;  %v185_v56 = vadd.f32 %v184_v49, %v182_v46  ;;  %v186_v57 = vstv %s444_s1  ;;  %v220_v58 = vmul.f32 %v219_v54, %v147_v35 }
  0x37   :  { %s306_s3 = sld [smem:[#allocation2 + $0x31]]  ;;  %v187_v59 = vmul.f32 %v186_v57, %v162_v45  ;;  %v203_v60 = vadd.f32 %v202_v52, %v200_v50  ;;  %v204_v61 = vstv %s447_s25 }
  0x38   :  { %s307_s4 = sld [smem:[#allocation2 + $0x32]]  ;;  %v205_v62 = vmul.f32 %v204_v61, %v162_v45  ;;  %v221_v63 = vadd.f32 %v220_v58, %v218_v53  ;;  %v222_v0 = vstv %s449_s26 }
  0x39   :  { %s462_s5 = sld [smem:[#allocation2 + $0x33]]  ;;  %v188_v1 = vadd.f32 %v187_v59, %v185_v56  ;;  %v189_v2 = vstv %s452_s27  ;;  %v223_v3 = vmul.f32 %v222_v0, %v162_v45 }
  0x3a   :  { %s309_s6 = sld [smem:[#allocation2 + $0x34]]  ;;  %v190_v4 = vmul.f32 %v189_v2, %v177_v55  ;;  %v206_v5 = vadd.f32 %v205_v62, %v203_v60  ;;  %v207_v6 = vstv %s303_s28 }
  0x3b   :  { %s310_s7 = sld [smem:[#allocation2 + $0x35]]  ;;  %v208_v7 = vmul.f32 %v207_v6, %v177_v55  ;;  %v224_v8 = vadd.f32 %v223_v3, %v221_v63  ;;  %v225_v9 = vstv %s454_s29 }
  0x3c   :  { %v191_v10 = vadd.f32 %v190_v4, %v188_v1  ;;  %v192_v11 = vstv %s457_s30  ;;  %v226_v12 = vmul.f32 %v225_v9, %v177_v55  ;;  %s311_s8 = sld [smem:[#allocation2 + $0x36]] }
  0x3d   :  { %v209_v13 = vadd.f32 %v208_v7, %v206_v5  ;;  %v210_v14 = vstv %s306_s3 }
  0x3e   :  { %v193_v15 = vadd.f32 %v192_v11, %v191_v10  ;;  %v227_v16 = vadd.f32 %v226_v12, %v224_v8  ;;  %v228_v17 = vstv %s307_s4 }
  0x3f   :  { %v211_v18 = vadd.f32 %v210_v14, %v209_v13  ;;  %v232_v22 = vstv %s462_s5 }
  0x40   :  { %v194_v19 = vmul.f32 0.2, %v193_v15  ;;  %v229_v20 = vadd.f32 %v228_v17, %v227_v16  ;;  %v234_v25 = vstv %s309_s6 }
  0x41   :  { %v212_v21 = vmul.f32 0.2, %v211_v18  ;;  %v237_v27 = vstv %s310_s7 }
  0x42   :  { %v195_v23 = vmax.f32 %v193_v15, %v194_v19  ;;  %v230_v24 = vmul.f32 0.2, %v229_v20  ;;  %v240_v33 = vstv %s311_s8 }
  0x43   :  { %v213_v26 = vmax.f32 %v211_v18, %v212_v21 }
  0x44   :  { %v231_v28 = vmax.f32 %v229_v20, %v230_v24  ;;  %v233_v29 = vmul.f32 %v232_v22, %v195_v23 }
  0x45   :  { %v235_v30 = vmul.f32 %v234_v25, %v213_v26 }
  0x46   :  { %v238_v31 = vmul.f32 %v237_v27, %v231_v28 }
  0x47   :  { %v236_v32 = vadd.f32 %v235_v30, %v233_v29 }
  0x49   :  { %v239_v34 = vadd.f32 %v238_v31, %v236_v32 }
  0x4b   :  { %v241_v35 = vadd.f32 %v240_v33, %v239_v34 }
  0x4d   :  { %242 = vst [vmem:[#allocation5] sm:$0x1] %v241_v35 }
  0x4e   :  { %333 = shalt.err (!%p330_p4)
}
  0x4f   :  { %252 = dma.vmem_to_hbm [thread:$0]  %s250_s10, 16, %s473_s2, [#allocation3]  }
  0x50   :  { %344 = dma.done.wait [#allocation3], 16  }
  0x51   :  { %345 = vsyncadd [#allocation3], 4294967280 }
  0x52   :  { %256 = vsyncpa [#allocation3], 1 }
  0x53   :  { %257 = vsyncpa [#allocation4], 1 }

</bundles_post_ra>
